<compile_context>
chip_gen: v7x
topology: tpu7x:2x2x1
jax: 0.10.0
libtpu: 0.0.40
codegen_flags: <defaults>
</compile_context>

<pallas_src>
import functools

import jax
import jax.numpy as jnp
from jax.experimental import pallas as pl
from jax.experimental.pallas import tpu as pltpu

_SUBLANE = 8  # row tiles kept a multiple of the f32 sublane width


def _round_up(n, m):
    return ((n + m - 1) // m) * m


def _vmem_capacity_bytes():
    """Per-core VMEM capacity; conservative fallback that also fits v7x."""
    try:
        info = pltpu.get_tpu_info()
        cap = getattr(info, "vmem_capacity_bytes", None)
        if cap:
            return int(cap)
    except Exception:
        pass
    return 64 * 1024 * 1024


def _mlp_fused_kernel(*refs, num_layers, matmul_precision):
    """Fused MLP on one row tile.

    refs = (x_ref, w0_ref, b0_ref, w1_ref, b1_ref, ..., o_ref)

    x_ref/o_ref are (tm, in_dim)/(tm, out_dim) streamed tiles; every w/b ref is
    VMEM-resident for the whole grid (constant index_map).  Matmuls accumulate
    in f32 on the MXU; bias add and ReLU stay in f32 on the VPU.
    """
    x_ref, o_ref = refs[0], refs[-1]
    wb = refs[1:-1]

    h = x_ref[...]
    for l in range(num_layers):
        w = wb[2 * l][...]
        b = wb[2 * l + 1][...]                      # (1, N) f32, broadcasts over rows
        lhs = h if h.dtype == w.dtype else h.astype(w.dtype)
        y = jnp.dot(lhs, w, preferred_element_type=jnp.float32,
                    precision=matmul_precision)
        y = y + b
        if l < num_layers - 1:
            y = jnp.maximum(y, 0.0)                 # ReLU on all but the last layer
        h = y
    o_ref[...] = h.astype(o_ref.dtype)


def mlp_forward(x, params, *, use_bf16_matmul=True, tile_rows_max=1024,
                min_grid_steps=4):
    """Apply the MLP.  params: list of (W (in,out), b (out,)) tuples."""
    lead_shape = x.shape[:-1]
    in_dim = x.shape[-1]
    dims_in = [w.shape[0] for w, _ in params]
    dims_out = [w.shape[1] for w, _ in params]
    out_dim = dims_out[-1]
    num_layers = len(params)
    assert dims_in[0] == in_dim

    compute_dtype = jnp.bfloat16 if use_bf16_matmul else jnp.float32
    out_dtype = x.dtype

    # Streamed activation: no padding; only a reshape (+ optional bf16 cast).
    x2d = x.reshape(-1, in_dim).astype(compute_dtype)
    M = x2d.shape[0]

    ws = [w.astype(compute_dtype) for w, _ in params]
    bs = [b.astype(jnp.float32).reshape(1, -1) for _, b in params]
    flat_wb = []
    for w, b in zip(ws, bs):
        flat_wb += [w, b]

    in_itemsize = jnp.dtype(compute_dtype).itemsize
    out_itemsize = jnp.dtype(out_dtype).itemsize
    wb_bytes = sum(w.size for w in ws) * in_itemsize + sum(b.size for b in bs) * 4
    max_dim = max(dims_in + dims_out)

    def _vmem_estimate(t):
        io = 2 * t * in_dim * in_itemsize + 2 * t * out_dim * out_itemsize
        act = 3 * t * max_dim * 4        # f32 temporaries of the unrolled layer loop
        return io + act + 2 * wb_bytes   # worst case: weights double-buffered

    vmem_cap = (_vmem_capacity_bytes() * 3) // 4     # headroom below physical
    budget = (vmem_cap * 2) // 3

    # Row tile: big enough to sit near the HBM roofline, small enough that the
    # grid has >= min_grid_steps steps (keeps both v7x TensorCores busy).
    tm = min(tile_rows_max,
             _round_up(max(pl.cdiv(M, min_grid_steps), _SUBLANE), _SUBLANE))
    while tm > _SUBLANE and _vmem_estimate(tm) > budget:
        tm = max(_SUBLANE, _round_up(tm // 2, _SUBLANE))

    grid = (pl.cdiv(M, tm),)
    vmem_limit = int(min(vmem_cap, max(32 * 1024 * 1024, 2 * _vmem_estimate(tm))))

    matmul_precision = None if use_bf16_matmul else jax.lax.Precision.HIGHEST
    kernel = functools.partial(_mlp_fused_kernel, num_layers=num_layers,
                               matmul_precision=matmul_precision)

    flops = 2 * M * sum(n * k for n, k in zip(dims_in, dims_out))
    bytes_accessed = (M * in_dim * in_itemsize + M * out_dim * out_itemsize
                      + wb_bytes)
    cost = pl.CostEstimate(flops=flops, transcendentals=0,
                           bytes_accessed=bytes_accessed)

    def _build_in_specs(weight_pipeline_mode):
        specs = [pl.BlockSpec((tm, in_dim), lambda i: (i, 0))]
        for w, b in zip(ws, bs):
            if weight_pipeline_mode is None:
                specs.append(pl.BlockSpec(w.shape, lambda i: (0, 0)))
                specs.append(pl.BlockSpec(b.shape, lambda i: (0, 0)))
            else:
                specs.append(pl.BlockSpec(w.shape, lambda i: (0, 0),
                                          pipeline_mode=weight_pipeline_mode))
                specs.append(pl.BlockSpec(b.shape, lambda i: (0, 0),
                                          pipeline_mode=weight_pipeline_mode))
        return specs

    def _run(weight_pipeline_mode):
        return pl.pallas_call(
            kernel,
            out_shape=jax.ShapeDtypeStruct((M, out_dim), out_dtype),
            grid=grid,
            in_specs=_build_in_specs(weight_pipeline_mode),
            out_specs=pl.BlockSpec((tm, out_dim), lambda i: (i, 0)),
            compiler_params=pltpu.CompilerParams(
                dimension_semantics=("parallel",),
                vmem_limit_bytes=vmem_limit),
            cost_estimate=cost,
        )(x2d, *flat_wb)

    try:
        # Weights/biases never change across the grid: ask for single-buffering.
        out2d = _run(pl.Buffered(1))
    except Exception:
        # Fallback: default double-buffering (still tiny for these weights).
        out2d = _run(None)

    return out2d.reshape(*lead_shape, out_dim)


def init_mlp_params(key, input_dim, hidden_dim, output_dim, num_layers,
                    dtype=jnp.float32):
    """Deterministic init matching nn.Linear shapes (stored transposed (in, out))."""
    h = [hidden_dim] * (num_layers - 1)
    dims_in = [input_dim] + h
    dims_out = h + [output_dim]
    params = []
    for n, k in zip(dims_in, dims_out):
        key, kw, kb = jax.random.split(key, 3)
        bound = 1.0 / (n ** 0.5)  # same range as torch.nn.Linear default init
        w = jax.random.uniform(kw, (n, k), dtype, minval=-bound, maxval=bound)
        b = jax.random.uniform(kb, (k,), dtype, minval=-bound, maxval=bound)
        params.append((w, b))
    return params


if __name__ == "__main__":
    key = jax.random.PRNGKey(0)
    input_dim, hidden_dim, output_dim, num_layers = 16, 32, 4, 3
    batch, seq = 2, 8

    kx, kp = jax.random.split(key)
    x = jax.random.normal(kx, (batch, seq, input_dim), dtype=jnp.float32)
    params = init_mlp_params(kp, input_dim, hidden_dim, output_dim, num_layers)

    # Pure-JAX reference of the forward semantics (exact f32 matmuls).
    h = x.reshape(-1, input_dim)
    for i, (w, b) in enumerate(params):
        h = jnp.dot(h, w, precision=jax.lax.Precision.HIGHEST) + b
        if i < num_layers - 1:
            h = jnp.maximum(h, 0.0)
    ref = h.reshape(batch, seq, output_dim)

    # Strict f32 path (precision=HIGHEST inside the kernel).
    out_f32 = jax.block_until_ready(mlp_forward(x, params, use_bf16_matmul=False))
    assert out_f32.shape == (batch, seq, output_dim), out_f32.shape
    assert jnp.allclose(out_f32, ref, atol=1e-5, rtol=1e-5)

    # Default path: bf16 matmul inputs, f32 accumulate (MXU-native on v5e/v6e/v7x).
    out_bf16 = jax.block_until_ready(mlp_forward(x, params))
    assert out_bf16.shape == (batch, seq, output_dim), out_bf16.shape
    assert jnp.allclose(out_bf16, ref, atol=5e-2, rtol=5e-2)

    print("KERNEL_OK")
</pallas_src>

<mosaic_0001>
module attributes {stable_mosaic.version = 11 : i64} {
  func.func @_mlp_fused_kernel(%arg0: i32, %arg1: memref<8x16xf32, #tpu.memory_space<vmem>>, %arg2: memref<16x32xf32, #tpu.memory_space<vmem>>, %arg3: memref<1x32xf32, #tpu.memory_space<vmem>>, %arg4: memref<32x32xf32, #tpu.memory_space<vmem>>, %arg5: memref<1x32xf32, #tpu.memory_space<vmem>>, %arg6: memref<32x4xf32, #tpu.memory_space<vmem>>, %arg7: memref<1x4xf32, #tpu.memory_space<vmem>>, %arg8: memref<8x4xf32, #tpu.memory_space<vmem>>) attributes {dimension_semantics = [#tpu.dimension_semantics<parallel>], iteration_bounds = array<i64: 2>, scalar_prefetch = 0 : i64, scratch_operands = 0 : i64, tpu.core_type = #tpu.core_type<tc>, window_params = [{transform_indices = @transform_0, window_bounds = array<i64: 8, 16>}, {pipeline_mode = #tpu.pipeline_mode<synchronous>, transform_indices = @transform_1, window_bounds = array<i64: 16, 32>}, {pipeline_mode = #tpu.pipeline_mode<synchronous>, transform_indices = @transform_2, window_bounds = array<i64: 1, 32>}, {pipeline_mode = #tpu.pipeline_mode<synchronous>, transform_indices = @transform_3, window_bounds = array<i64: 32, 32>}, {pipeline_mode = #tpu.pipeline_mode<synchronous>, transform_indices = @transform_4, window_bounds = array<i64: 1, 32>}, {pipeline_mode = #tpu.pipeline_mode<synchronous>, transform_indices = @transform_5, window_bounds = array<i64: 32, 4>}, {pipeline_mode = #tpu.pipeline_mode<synchronous>, transform_indices = @transform_6, window_bounds = array<i64: 1, 4>}, {transform_indices = @transform_7, window_bounds = array<i64: 8, 4>}]} {
    %c0 = arith.constant 0 : index
    %c0_0 = arith.constant 0 : index
    %0 = vector.load %arg1[%c0, %c0_0] : memref<8x16xf32, #tpu.memory_space<vmem>>, vector<8x16xf32>
    %c0_1 = arith.constant 0 : index
    %c0_2 = arith.constant 0 : index
    %1 = vector.load %arg2[%c0_1, %c0_2] : memref<16x32xf32, #tpu.memory_space<vmem>>, vector<16x32xf32>
    %c0_3 = arith.constant 0 : index
    %c0_4 = arith.constant 0 : index
    %2 = vector.load %arg3[%c0_3, %c0_4] : memref<1x32xf32, #tpu.memory_space<vmem>>, vector<1x32xf32>
    %cst = arith.constant dense<0.000000e+00> : vector<8x32xf32>
    %3 = tpu.matmul %0, %1, %cst {dimension_numbers = #tpu.dot_dimension_numbers<[1], [0], [0], [1], [0, 0, 1, 1], [], []>, precision = #tpu.contract_precision<fp32>} : vector<8x16xf32>, vector<16x32xf32>, vector<8x32xf32> -> vector<8x32xf32>
    %4 = vector.broadcast %2 : vector<1x32xf32> to vector<8x32xf32>
    %5 = arith.addf %3, %4 : vector<8x32xf32>
    %cst_5 = arith.constant 0.000000e+00 : f32
    %6 = vector.broadcast %cst_5 : f32 to vector<8x32xf32>
    %7 = arith.maximumf %5, %6 : vector<8x32xf32>
    %c0_6 = arith.constant 0 : index
    %c0_7 = arith.constant 0 : index
    %8 = vector.load %arg4[%c0_6, %c0_7] : memref<32x32xf32, #tpu.memory_space<vmem>>, vector<32x32xf32>
    %c0_8 = arith.constant 0 : index
    %c0_9 = arith.constant 0 : index
    %9 = vector.load %arg5[%c0_8, %c0_9] : memref<1x32xf32, #tpu.memory_space<vmem>>, vector<1x32xf32>
    %cst_10 = arith.constant dense<0.000000e+00> : vector<8x32xf32>
    %10 = tpu.matmul %7, %8, %cst_10 {dimension_numbers = #tpu.dot_dimension_numbers<[1], [0], [0], [1], [0, 0, 1, 1], [], []>, precision = #tpu.contract_precision<fp32>} : vector<8x32xf32>, vector<32x32xf32>, vector<8x32xf32> -> vector<8x32xf32>
    %11 = vector.broadcast %9 : vector<1x32xf32> to vector<8x32xf32>
    %12 = arith.addf %10, %11 : vector<8x32xf32>
    %cst_11 = arith.constant 0.000000e+00 : f32
    %13 = vector.broadcast %cst_11 : f32 to vector<8x32xf32>
    %14 = arith.maximumf %12, %13 : vector<8x32xf32>
    %c0_12 = arith.constant 0 : index
    %c0_13 = arith.constant 0 : index
    %15 = vector.load %arg6[%c0_12, %c0_13] : memref<32x4xf32, #tpu.memory_space<vmem>>, vector<32x4xf32>
    %c0_14 = arith.constant 0 : index
    %c0_15 = arith.constant 0 : index
    %16 = vector.load %arg7[%c0_14, %c0_15] : memref<1x4xf32, #tpu.memory_space<vmem>>, vector<1x4xf32>
    %cst_16 = arith.constant dense<0.000000e+00> : vector<8x4xf32>
    %17 = tpu.matmul %14, %15, %cst_16 {dimension_numbers = #tpu.dot_dimension_numbers<[1], [0], [0], [1], [0, 0, 1, 1], [], []>, precision = #tpu.contract_precision<fp32>} : vector<8x32xf32>, vector<32x4xf32>, vector<8x4xf32> -> vector<8x4xf32>
    %18 = vector.broadcast %16 : vector<1x4xf32> to vector<8x4xf32>
    %19 = arith.addf %17, %18 : vector<8x4xf32>
    %c0_17 = arith.constant 0 : index
    %c0_18 = arith.constant 0 : index
    %20 = vector.load %arg8[%c0_17, %c0_18] : memref<8x4xf32, #tpu.memory_space<vmem>>, vector<8x4xf32>
    tpu.vector_store %arg8[%c0_17, %c0_18], %19 {strides = array<i32>} : memref<8x4xf32, #tpu.memory_space<vmem>>, vector<8x4xf32>,
    return
  }
  func.func @transform_0(%arg0: i32) -> (i32, i32) {
    %c0_i32 = arith.constant 0 : i32
    %c0_i32_0 = arith.constant 0 : i32
    return %arg0, %c0_i32 : i32, i32
  }
  func.func @transform_1(%arg0: i32) -> (i32, i32) {
    %c0_i32 = arith.constant 0 : i32
    %c0_i32_0 = arith.constant 0 : i32
    %c0_i32_1 = arith.constant 0 : i32
    return %c0_i32, %c0_i32_0 : i32, i32
  }
  func.func @transform_2(%arg0: i32) -> (i32, i32) {
    %c0_i32 = arith.constant 0 : i32
    %c0_i32_0 = arith.constant 0 : i32
    %c0_i32_1 = arith.constant 0 : i32
    return %c0_i32, %c0_i32_0 : i32, i32
  }
  func.func @transform_3(%arg0: i32) -> (i32, i32) {
    %c0_i32 = arith.constant 0 : i32
    %c0_i32_0 = arith.constant 0 : i32
    %c0_i32_1 = arith.constant 0 : i32
    return %c0_i32, %c0_i32_0 : i32, i32
  }
  func.func @transform_4(%arg0: i32) -> (i32, i32) {
    %c0_i32 = arith.constant 0 : i32
    %c0_i32_0 = arith.constant 0 : i32
    %c0_i32_1 = arith.constant 0 : i32
    return %c0_i32, %c0_i32_0 : i32, i32
  }
  func.func @transform_5(%arg0: i32) -> (i32, i32) {
    %c0_i32 = arith.constant 0 : i32
    %c0_i32_0 = arith.constant 0 : i32
    %c0_i32_1 = arith.constant 0 : i32
    return %c0_i32, %c0_i32_0 : i32, i32
  }
  func.func @transform_6(%arg0: i32) -> (i32, i32) {
    %c0_i32 = arith.constant 0 : i32
    %c0_i32_0 = arith.constant 0 : i32
    %c0_i32_1 = arith.constant 0 : i32
    return %c0_i32, %c0_i32_0 : i32, i32
  }
  func.func @transform_7(%arg0: i32) -> (i32, i32) {
    %c0_i32 = arith.constant 0 : i32
    %c0_i32_0 = arith.constant 0 : i32
    return %arg0, %c0_i32 : i32, i32
  }
}

module attributes {stable_mosaic.version = 11 : i64} {
  func.func @_mlp_fused_kernel(%arg0: i32, %arg1: memref<8x16xf32, #tpu.memory_space<vmem>>, %arg2: memref<16x32xf32, #tpu.memory_space<vmem>>, %arg3: memref<1x32xf32, #tpu.memory_space<vmem>>, %arg4: memref<32x32xf32, #tpu.memory_space<vmem>>, %arg5: memref<1x32xf32, #tpu.memory_space<vmem>>, %arg6: memref<32x4xf32, #tpu.memory_space<vmem>>, %arg7: memref<1x4xf32, #tpu.memory_space<vmem>>, %arg8: memref<8x4xf32, #tpu.memory_space<vmem>>) attributes {dimension_semantics = [#tpu.dimension_semantics<parallel>], iteration_bounds = array<i64: 2>, scalar_prefetch = 0 : i64, scratch_operands = 0 : i64, tpu.core_type = #tpu.core_type<tc>, window_params = [{transform_indices = @transform_0, window_bounds = array<i64: 8, 16>}, {pipeline_mode = #tpu.pipeline_mode<synchronous>, transform_indices = @transform_1, window_bounds = array<i64: 16, 32>}, {pipeline_mode = #tpu.pipeline_mode<synchronous>, transform_indices = @transform_2, window_bounds = array<i64: 1, 32>}, {pipeline_mode = #tpu.pipeline_mode<synchronous>, transform_indices = @transform_3, window_bounds = array<i64: 32, 32>}, {pipeline_mode = #tpu.pipeline_mode<synchronous>, transform_indices = @transform_4, window_bounds = array<i64: 1, 32>}, {pipeline_mode = #tpu.pipeline_mode<synchronous>, transform_indices = @transform_5, window_bounds = array<i64: 32, 4>}, {pipeline_mode = #tpu.pipeline_mode<synchronous>, transform_indices = @transform_6, window_bounds = array<i64: 1, 4>}, {transform_indices = @transform_7, window_bounds = array<i64: 8, 4>}]} {
    %c0 = arith.constant 0 : index
    %c0_0 = arith.constant 0 : index
    %0 = vector.load %arg1[%c0, %c0_0] : memref<8x16xf32, #tpu.memory_space<vmem>>, vector<8x16xf32>
    %c0_1 = arith.constant 0 : index
    %c0_2 = arith.constant 0 : index
    %1 = vector.load %arg2[%c0_1, %c0_2] : memref<16x32xf32, #tpu.memory_space<vmem>>, vector<16x32xf32>
    %c0_3 = arith.constant 0 : index
    %c0_4 = arith.constant 0 : index
    %2 = vector.load %arg3[%c0_3, %c0_4] : memref<1x32xf32, #tpu.memory_space<vmem>>, vector<1x32xf32>
    %cst = arith.constant dense<0.000000e+00> : vector<8x32xf32>
    %3 = tpu.matmul %0, %1, %cst {dimension_numbers = #tpu.dot_dimension_numbers<[1], [0], [0], [1], [0, 0, 1, 1], [], []>, precision = #tpu.contract_precision<fp32>} : vector<8x16xf32>, vector<16x32xf32>, vector<8x32xf32> -> vector<8x32xf32>
    %4 = vector.broadcast %2 : vector<1x32xf32> to vector<8x32xf32>
    %5 = arith.addf %3, %4 : vector<8x32xf32>
    %cst_5 = arith.constant 0.000000e+00 : f32
    %6 = vector.broadcast %cst_5 : f32 to vector<8x32xf32>
    %7 = arith.maximumf %5, %6 : vector<8x32xf32>
    %c0_6 = arith.constant 0 : index
    %c0_7 = arith.constant 0 : index
    %8 = vector.load %arg4[%c0_6, %c0_7] : memref<32x32xf32, #tpu.memory_space<vmem>>, vector<32x32xf32>
    %c0_8 = arith.constant 0 : index
    %c0_9 = arith.constant 0 : index
    %9 = vector.load %arg5[%c0_8, %c0_9] : memref<1x32xf32, #tpu.memory_space<vmem>>, vector<1x32xf32>
    %cst_10 = arith.constant dense<0.000000e+00> : vector<8x32xf32>
    %10 = tpu.matmul %7, %8, %cst_10 {dimension_numbers = #tpu.dot_dimension_numbers<[1], [0], [0], [1], [0, 0, 1, 1], [], []>, precision = #tpu.contract_precision<fp32>} : vector<8x32xf32>, vector<32x32xf32>, vector<8x32xf32> -> vector<8x32xf32>
    %11 = vector.broadcast %9 : vector<1x32xf32> to vector<8x32xf32>
    %12 = arith.addf %10, %11 : vector<8x32xf32>
    %cst_11 = arith.constant 0.000000e+00 : f32
    %13 = vector.broadcast %cst_11 : f32 to vector<8x32xf32>
    %14 = arith.maximumf %12, %13 : vector<8x32xf32>
    %c0_12 = arith.constant 0 : index
    %c0_13 = arith.constant 0 : index
    %15 = vector.load %arg6[%c0_12, %c0_13] : memref<32x4xf32, #tpu.memory_space<vmem>>, vector<32x4xf32>
    %c0_14 = arith.constant 0 : index
    %c0_15 = arith.constant 0 : index
    %16 = vector.load %arg7[%c0_14, %c0_15] : memref<1x4xf32, #tpu.memory_space<vmem>>, vector<1x4xf32>
    %cst_16 = arith.constant dense<0.000000e+00> : vector<8x4xf32>
    %17 = tpu.matmul %14, %15, %cst_16 {dimension_numbers = #tpu.dot_dimension_numbers<[1], [0], [0], [1], [0, 0, 1, 1], [], []>, precision = #tpu.contract_precision<fp32>} : vector<8x32xf32>, vector<32x4xf32>, vector<8x4xf32> -> vector<8x4xf32>
    %18 = vector.broadcast %16 : vector<1x4xf32> to vector<8x4xf32>
    %19 = arith.addf %17, %18 : vector<8x4xf32>
    %c0_17 = arith.constant 0 : index
    %c0_18 = arith.constant 0 : index
    %20 = vector.load %arg8[%c0_17, %c0_18] : memref<8x4xf32, #tpu.memory_space<vmem>>, vector<8x4xf32>
    tpu.vector_store %arg8[%c0_17, %c0_18], %19 {strides = array<i32>} : memref<8x4xf32, #tpu.memory_space<vmem>>, vector<8x4xf32>,
    return
  }
  func.func @transform_0(%arg0: i32) -> (i32, i32) {
    %c0_i32 = arith.constant 0 : i32
    %c0_i32_0 = arith.constant 0 : i32
    return %arg0, %c0_i32 : i32, i32
  }
  func.func @transform_1(%arg0: i32) -> (i32, i32) {
    %c0_i32 = arith.constant 0 : i32
    %c0_i32_0 = arith.constant 0 : i32
    %c0_i32_1 = arith.constant 0 : i32
    return %c0_i32, %c0_i32_0 : i32, i32
  }
  func.func @transform_2(%arg0: i32) -> (i32, i32) {
    %c0_i32 = arith.constant 0 : i32
    %c0_i32_0 = arith.constant 0 : i32
    %c0_i32_1 = arith.constant 0 : i32
    return %c0_i32, %c0_i32_0 : i32, i32
  }
  func.func @transform_3(%arg0: i32) -> (i32, i32) {
    %c0_i32 = arith.constant 0 : i32
    %c0_i32_0 = arith.constant 0 : i32
    %c0_i32_1 = arith.constant 0 : i32
    return %c0_i32, %c0_i32_0 : i32, i32
  }
  func.func @transform_4(%arg0: i32) -> (i32, i32) {
    %c0_i32 = arith.constant 0 : i32
    %c0_i32_0 = arith.constant 0 : i32
    %c0_i32_1 = arith.constant 0 : i32
    return %c0_i32, %c0_i32_0 : i32, i32
  }
  func.func @transform_5(%arg0: i32) -> (i32, i32) {
    %c0_i32 = arith.constant 0 : i32
    %c0_i32_0 = arith.constant 0 : i32
    %c0_i32_1 = arith.constant 0 : i32
    return %c0_i32, %c0_i32_0 : i32, i32
  }
  func.func @transform_6(%arg0: i32) -> (i32, i32) {
    %c0_i32 = arith.constant 0 : i32
    %c0_i32_0 = arith.constant 0 : i32
    %c0_i32_1 = arith.constant 0 : i32
    return %c0_i32, %c0_i32_0 : i32, i32
  }
  func.func @transform_7(%arg0: i32) -> (i32, i32) {
    %c0_i32 = arith.constant 0 : i32
    %c0_i32_0 = arith.constant 0 : i32
    return %arg0, %c0_i32 : i32, i32
  }
}

</mosaic_0001>

<bundles_post_ra>
// kernel: tpu_custom_call.1
= control target key start
LH: loop header
LB: loop body
LE: loop exit
PB: predicated region body
PF: predicated region fallthrough
CT: control target
= control target key end

     0   :  { %12 = vsyncpa [#allocation3], 0  ;;  %s2698_s0 = inlined_call_operand.hbm [shape: f32[16,16], index: 0, kind: input, shape index: {}]   ;;  %s2699_s1 = inlined_call_operand.hbm [shape: f32[16,32], index: 1, kind: input, shape index: {}]   ;;  %s2700_s2 = inlined_call_operand.vmem [shape: f32[1,32], index: 2, kind: input, shape index: {}]   ;;  %s2701_s3 = inlined_call_operand.vmem [shape: f32[32,32], index: 3, kind: input, shape index: {}]   ;;  %s2702_s4 = inlined_call_operand.vmem [shape: f32[1,32], index: 4, kind: input, shape index: {}]   ;;  %s2703_s5 = inlined_call_operand.vmem [shape: f32[32,4], index: 5, kind: input, shape index: {}]   ;;  %s2704_s6 = inlined_call_operand.vmem [shape: f32[1,4], index: 6, kind: input, shape index: {}]   ;;  %s2705_s7 = inlined_call_operand.vmem [shape: f32[16,4], index: 7, kind: output, shape index: {}]  }
   0x1   :  { %14 = vsyncpa [#allocation3 + $0x1], 0 }
   0x2   :  { %15 = vsyncpa [#allocation5], 0  ;;  %s2448_s24 = smov 0   ;;  %s2450_s25 = smov 0  }
   0x3   :  { %s2452_s26 = smov 0   ;;  %s2454_s27 = smov 0  }
   0x4 LB: > { %s2467_s28 = sadd.s32 4294967295, %s2399_s27   ;;  %p41_p0 = scmp.ne.s32.totalorder %s2391_s25, %s2387_s24  ;;  %s2399_s27 = sphi %s2454_s27, %s2720_s27   ;;  %s2395_s26 = sphi %s2452_s26, %s2719_s26   ;;  %s2391_s25 = sphi %s2450_s25, %s2718_s25   ;;  %s2387_s24 = sphi %s2448_s24, %s2717_s24  }
   0x5   : > { %p2706_p1 = scmp.eq.s32.totalorder %s2467_s28, 0  ;;  %p1861_p2 = scmp.ge.s32.totalorder %s2399_s27, 1 }
   0x6   : > { %p204_p3 = scmp.lt.s32.totalorder %s2399_s27, 3  ;;  %s2401_s8 = smov [#allocation4]  }
   0x7   : > { %p2475_p4 = por %p2706_p1, %p41_p0  ;;  %s216_s9 = sshll.u32 %s2401_s8, 4  ;;  %s217_s9 = int_to_ptr.vmem [resolvable:$true] %s216_s9 }
   0x8   : > { %p2479_p5 = pnand %p1861_p2, %p204_p3  ;;  %s2492_s11 = sadd.s32 1, %s2399_s27  }
   0x9   : > { %s2709_s29 = scalar_select %p2475_p4, 1, 0 }
   0xa   : > { %s2710_s30 = scalar_select %p2479_p5, 1, 0 }
   0xb   : > { %p2254_p6 = pneg %p2479_p5  ;;  %s28_s12 = sadd.s32 1, %s2395_s26 }
   0xc   : > { %s25_s13 = ssub.s32 %s2399_s27, %s2492_s11  ;;  %s2303_s16 = scalar_lea.hbm %s2699_s1, 256 }
   0xd   : > { %p2487_p7 = pnand %p2254_p6, %p2706_p1  ;;  %p2304_p8 = scmp.ne.s32.totalorder %s2699_s1, %s2303_s16 }
   0xe   : > { %p2310_p12 = scmp.lt.u32.totalorder %s2303_s16, %s2699_s1 }
   0xf   : > { %p2305_p9 = pneg %p2487_p7 }
  0x11   : > { %p2306_p10 = pnand %p2305_p9, %p2304_p8 }
  0x13   : > { %p2307_p11 = pneg %p2306_p10 }
  0x15   : > { %p2312_p13 = pnand %p2310_p12, %p2307_p11 }
  0x17   : > { %2315 = shalt.err (!%p2312_p13)
}
  0x18   : > { %s2316_s21 = scalar_lea.vmem %s217_s9, 256  ;;  %p2324_p6 = scmp.lt.s32.totalorder %s217_s9, %s217_s9 }
  0x19   : > { %p2317_p0 = scmp.ne.s32.totalorder %s217_s9, %s2316_s21  ;;  %p2325_p1 = scmp.lt.s32.totalorder %s2316_s21, %s2316_s21 }
  0x1b   : > { %p2319_p2 = pnand %p2317_p0, %p2305_p9  ;;  %p2326_p4 = por %p2325_p1, %p2324_p6 }
  0x1d   : > { %p2320_p3 = pneg %p2319_p2 }
  0x1f   : > { %p2327_p5 = pnand %p2326_p4, %p2320_p3 }
  0x21   : > { %2330 = shalt.err (!%p2327_p5)
}
  0x22   : > { %s2402_s22 = smov 128   ;;  %s2403_s23 = smov 8  }
  0x23   : > { %2257 = dma.hbm_to_vmem [thread:$0]  (!%p2487_p7), %s2699_s1, 256, %s217_s9, [#allocation5], %s2402_s22, %s2402_s22, %s2403_s23  }
  0x24   : > { %p26_p8 = scmp.eq.s32.totalorder %s25_s13, 0  ;;  %p35_p9 = scmp.ne.s32.totalorder %s2395_s26, %s2391_s25 }
  0x25   : > { %p36_p1 = scmp.eq.s32.totalorder %s2399_s27, 0  ;;  %p2263_p4 = scmp.lt.s32.totalorder %s2399_s27, 2 }
  0x26   : > { %s2518_s14 = scalar_select %p26_p8, %s2395_s26, %s28_s12  }
  0x27   : > { %p37_p5 = por %p36_p1, %p35_p9  ;;  %s245_s15 = sand.u32 1, %s2395_s26  }
  0x28   : > { %s1864_s16 = sshll.u32 %s245_s15, 3  ;;  %s1865_s17 = sshll.u32 %s2399_s27, 7 }
  0x29   : > { %s2525_s20 = scalar_lea.hbm %s2698_s0, %s1865_s17  ;;  %s249_s9 = scalar_lea.vmem [#allocation2], %s1864_s16 }
  0x2a   : > { %s256_s10 = sshll.u32 %s249_s9, 4  ;;  %p2529_p7 = pnand %p2263_p4, %p37_p5  ;;  %s2527_s10 = int_to_ptr.vmem [resolvable:$true] %s256_s10 }
  0x2b   : > { %s246_s27 = scalar_lea.sflag [#allocation3], %s245_s15  ;;  %s2331_s13 = scalar_lea.hbm %s2525_s20, 128 }
  0x2c   : > { %p2332_p10 = scmp.ne.s32.totalorder %s2525_s20, %s2331_s13  ;;  %p2333_p11 = pneg %p2529_p7 }
  0x2d   : > { %s2336_s23 = scalar_lea.hbm %s2698_s0, 256  ;;  %p2337_p0 = scmp.lt.u32.totalorder %s2525_s20, %s2698_s0 }
  0x2e   : > { %p2334_p12 = pnand %p2333_p11, %p2332_p10  ;;  %p2338_p2 = scmp.lt.u32.totalorder %s2336_s23, %s2331_s13 }
  0x2f   : > { %p2340_p6 = scmp.lt.u32.totalorder %s2331_s13, %s2525_s20 }
  0x30   : > { %p2335_p13 = pneg %p2334_p12  ;;  %p2339_p3 = por %p2338_p2, %p2337_p0 }
  0x32   : > { %p2341_p8 = por %p2340_p6, %p2339_p3 }
  0x34   : > { %p2342_p9 = pnand %p2341_p8, %p2335_p13 }
  0x36   : > { %2345 = shalt.err (!%p2342_p9)
}
  0x37   : > { %s2346_s15 = scalar_lea.vmem %s2527_s10, 128  ;;  %s2404_s16 = smov [#allocation2]  }
  0x38   : > { %p2347_p1 = scmp.ne.s32.totalorder %s2527_s10, %s2346_s15  ;;  %s2351_s17 = sshll.u32 %s2404_s16, 4  ;;  %s2352_s17 = int_to_ptr.vmem [resolvable:$false] %s2351_s17 }
  0x39   : > { %s2353_s18 = scalar_lea.vmem %s2352_s17, 256  ;;  %p2354_p10 = scmp.lt.s32.totalorder %s2527_s10, %s2352_s17 }
  0x3a   : > { %p2349_p4 = pnand %p2347_p1, %p2333_p11  ;;  %p2355_p12 = scmp.lt.s32.totalorder %s2353_s18, %s2346_s15 }
  0x3c   : > { %p2350_p5 = pneg %p2349_p4  ;;  %p2356_p0 = por %p2355_p12, %p2354_p10 }
  0x3e   : > { %p2357_p2 = pnand %p2356_p0, %p2350_p5 }
  0x40   : > { %2360 = shalt.err (!%p2357_p2)
}
  0x41   : > { %2261 = dma.hbm_to_vmem [thread:$0]  (!%p2529_p7), %s2525_s20, 128, %s2527_s10, %s246_s27  }
  0x42   : > { %p2713_p13 = scmp.ne.s32.totalorder %s2710_s30, 0 }
  0x43   : > { %s267_s19 = sand.u32 (!%p2713_p13), 1, %s2391_s25   ;;  %p2714_p11 = scmp.ne.s32.totalorder (!%p2713_p13), %s2709_s29, 0 }
  0x44   : > { %265 = sbr.rel (%p2713_p13) target bundleno = 860 (0x35c), region = 48  ;;  %s1867_s9 = sshll.u32 (!%p2713_p13), %s267_s19, 3 }
  0x45   : > { %s268_s13 = scalar_lea.sflag (!%p2713_p13), [#allocation3], %s267_s19  ;;  %s271_s21 = scalar_lea.vmem (!%p2713_p13), [#allocation2], %s1867_s9 }
  0x4b   : > { %2378 = dma.done.wait (%p2714_p11), %s268_s13, 128  }
  0x4c   : > { %2380 = vsyncadd (%p2714_p11), %s268_s13, 4294967168  ;;  %p2715_p3 = scmp.eq.s32.totalorder %s2467_s28, 0 }
  0x4e   : > { %2382 = dma.done.wait (%p2715_p3), [#allocation5], 256   ;;  %p2716_p6 = pmov %p2715_p3 }
  0x4f   : > { %v2405_v0 = vmov 0.0|0.0   ;;  %vm2406_vm0 = vmmov 0   ;;  %v2407_v1 = vmov 0.0   ;;  %vm319_vm1 = vcmask 130048   ;;  %v310_v2 = vld [vmem:[#allocation4] sm:$0xff]  ;;  %v311_v3 = vld [vmem:[#allocation4 + $0x8] sm:$0xff] }
  0x50   : > { %2384 = vsyncadd (%p2716_p6), [#allocation5], 4294967040  ;;  %2130 = vmatprep.subr.bf16.mxu0 %v2405_v0  ;;  %1964 = vmatprep.mubr.msk.f32.mxu0 %vm2406_vm0, %v2407_v1  ;;  %v309_v4 = vld [vmem:[%s271_s21] sm:$0xff]  ;;  %v324_v5 = vand.u32 4294901760, %v310_v2  ;;  %v327_v6 = vand.u32 4294901760, %v311_v3  ;;  %v785_v32 = vld [vmem:[%s2701_s3 + $0x10] sm:$0xff] }
  0x51   : > { %2127 = vmatprep.subr.bf16.mxu1 %v2405_v0  ;;  %1957 = vmatprep.mubr.msk.f32.mxu1 %vm2406_vm0, %v2407_v1  ;;  %v321_v7 = vsel %vm319_vm1, %v309_v4, 0  ;;  %v783_v25 = vld [vmem:[%s2701_s3] sm:$0xff]  ;;  %v784_v26 = vld [vmem:[%s2701_s3 + $0x8] sm:$0xff]  ;;  %v786_v33 = vld [vmem:[%s2701_s3 + $0x18] sm:$0xff]  ;;  %v805_v34 = vand.u32 4294901760, %v785_v32  ;;  %vm794_vm2 = vcmask 261120  }
  0x52   : > { %v390_v8 = vand.u32 4294901760, %v321_v7  ;;  %v402_v9 = vsub.f32 %v310_v2, %v324_v5  ;;  %v409_v10 = vsub.f32 %v311_v3, %v327_v6  ;;  %v2128_v11 = vpack.c.bf16 %v327_v6, %v324_v5  ;;  %v1870_v59 = vld [vmem:[%s2700_s2] ss:$0 sm:$0xff]  ;;  %p305_p7 = scmp.lt.s32.totalorder %s2467_s28, 1 }
  0x53   : > { %v799_v27 = vand.u32 4294901760, %v783_v25  ;;  %v802_v28 = vand.u32 4294901760, %v784_v26  ;;  %v808_v35 = vand.u32 4294901760, %v786_v33  ;;  %v893_v39 = vsub.f32 %v785_v32, %v805_v34 }
  0x54   : > { %v391_v12 = vsub.f32 %v321_v7, %v390_v8  ;;  %v403_v13 = vand.u32 4294901760, %v402_v9  ;;  %v410_v14 = vand.u32 4294901760, %v409_v10  ;;  %2129 = vmatpush3.bf16.msra.mxu1 %v2128_v11  ;;  %v2134_v23 = vpack.c.bf16 %v409_v10, %v402_v9  ;;  %s2722_s28 = smov (!%p305_p7, %s2467_s28), 1 }
  0x55   : > { %2145 = vmatprep.subr.bf16.mxu1 %v2405_v0  ;;  %v2599_v29 = vpack.c.bf16 %v802_v28, %v799_v27  ;;  %v879_v30 = vsub.f32 %v783_v25, %v799_v27  ;;  %v886_v31 = vsub.f32 %v784_v26, %v802_v28  ;;  %v2609_v38 = vpack.c.bf16 %v808_v35, %v805_v34  ;;  %s1869_s12 = sshll.u32 %s2722_s28, 3 }
  0x56   : > { %v392_v15 = vand.u32 4294901760, %v391_v12  ;;  %v404_v16 = vsub.f32 %v402_v9, %v403_v13  ;;  %v411_v17 = vsub.f32 %v409_v10, %v410_v14  ;;  %v2140_v24 = vpack.c.bf16 %v410_v14, %v403_v13  ;;  %v1284_v9 = vld [vmem:[%s2703_s5] sm:$0xff]  ;;  %v1285_v10 = vld [vmem:[%s2703_s5 + $0x8] sm:$0xff]  ;;  %s308_s23 = scalar_lea.vmem %s2705_s7, %s1869_s12 }
  0x57   : > { %v880_v36 = vand.u32 4294901760, %v879_v30  ;;  %v887_v37 = vand.u32 4294901760, %v886_v31  ;;  %v900_v40 = vsub.f32 %v786_v33, %v808_v35  ;;  %v894_v44 = vand.u32 4294901760, %v893_v39 }
  0x58   : > { %v393_v18 = vsub.f32 %v391_v12, %v392_v15  ;;  %v405_v19 = vand.u32 4294901760, %v404_v16  ;;  %v412_v20 = vand.u32 4294901760, %v411_v17  ;;  %v2158_v53 = vpack.c.bf16 %v886_v31, %v879_v30  ;;  %v1287_v16 = vld [vmem:[%s2703_s5 + $0x18] sm:$0xff] }
  0x59   : > { %v881_v41 = vsub.f32 %v879_v30, %v880_v36  ;;  %v888_v42 = vsub.f32 %v886_v31, %v887_v37  ;;  %v901_v45 = vand.u32 4294901760, %v900_v40  ;;  %v895_v47 = vsub.f32 %v893_v39, %v894_v44 }
  0x5a   : > { %v394_v21 = vand.u32 4294901760, %v393_v18  ;;  %v2131_v22 = vpack.c.bf16 %v412_v20, %v405_v19  ;;  %v2161_v54 = vpack.c.bf16 %v900_v40, %v893_v39  ;;  %v2170_v55 = vpack.c.bf16 %v887_v37, %v880_v36 }
  0x5b   : > { %v882_v43 = vand.u32 4294901760, %v881_v41  ;;  %v889_v46 = vand.u32 4294901760, %v888_v42  ;;  %v902_v48 = vsub.f32 %v900_v40, %v901_v45  ;;  %v896_v50 = vand.u32 4294901760, %v895_v47  ;;  %v1871_v41 = vld [vmem:[%s2702_s4] ss:$0 sm:$0xff] }
  0x5c   : > { %1958 = vmatmul.mubr.f32.vlgmr.msra.gmra.mrb[0].mxu1 %v394_v21  ;;  %2132 = vmatpush3.bf16.msra.mxu0 %v2131_v22  ;;  %v2173_v56 = vpack.c.bf16 %v901_v45, %v894_v44  ;;  %v1308_v20 = vand.u32 4294901760, %v1287_v16  ;;  %vm1783_vm3 = vcmask 31744  }
  0x5d   : > { %2003 = vmatprep.mubr.msk.f32.mxu1 %vm2406_vm0, %v2407_v1  ;;  %2133 = vmatprep.subr.bf16.mxu0 %v2405_v0  ;;  %v2152_v49 = vpack.c.bf16 %v889_v46, %v882_v43  ;;  %v903_v51 = vand.u32 4294901760, %v902_v48 }
  0x5e   : > { %2147 = vmatpush3.bf16.msra.mxu1 %v2599_v29 }
  0x5f   : > { %1965 = vmatmul.mubr.f32.vlgmr.msra.gmra.mrb[0].mxu0 %v390_v8  ;;  %2148 = vmatprep.subr.bf16.mxu1 %v2405_v0  ;;  %v2155_v52 = vpack.c.bf16 %v903_v51, %v896_v50 }
  0x60   : > { %2135 = vmatpush3.bf16.msra.mxu0 %v2134_v23  ;;  %1971 = vmatprep.mubr.msk.f32.mxu0 %vm2406_vm0, %v2407_v1 }
  0x61   : > { %2136 = vmatprep.subr.bf16.mxu0 %v2405_v0 }
  0x62   : > { %2150 = vmatpush3.bf16.msra.mxu1 %v2609_v38 }
  0x63   : > { %2151 = vmatprep.subr.bf16.mxu1 %v2405_v0 }
  0x67   : > { %1972 = vmatmul.mubr.f32.vlgmr.msra.gmra.mrb[0].mxu0 %v391_v12  ;;  %v1302_v12 = vand.u32 4294901760, %v1285_v10 }
  0x68   : > { %2138 = vmatpush3.bf16.msra.mxu0 %v2128_v11  ;;  %1978 = vmatprep.mubr.msk.f32.mxu0 %vm2406_vm0, %v2407_v1 }
  0x69   : > { %2139 = vmatprep.subr.bf16.mxu0 %v2405_v0  ;;  %v1386_v14 = vsub.f32 %v1285_v10, %v1302_v12 }
  0x6b   : > { %v1387_v18 = vand.u32 4294901760, %v1386_v14 }
  0x6d   : > { %v1388_v22 = vsub.f32 %v1386_v14, %v1387_v18 }
  0x6f   : > { %1979 = vmatmul.mubr.f32.vlgmr.msra.gmra.mrb[0].mxu0 %v392_v15  ;;  %v1286_v15 = vld [vmem:[%s2703_s5 + $0x10] sm:$0xff]  ;;  %v1389_v26 = vand.u32 4294901760, %v1388_v22 }
  0x70   : > { %2141 = vmatpush3.bf16.msra.mxu0 %v2140_v24  ;;  %1985 = vmatprep.mubr.msk.f32.mxu0 %vm2406_vm0, %v2407_v1  ;;  %v1305_v19 = vand.u32 4294901760, %v1286_v15  ;;  %v1400_v24 = vsub.f32 %v1287_v16, %v1308_v20 }
  0x71   : > { %2142 = vmatprep.subr.bf16.mxu0 %v2405_v0 }
  0x72   : > { %v1393_v23 = vsub.f32 %v1286_v15, %v1305_v19  ;;  %v1401_v28 = vand.u32 4294901760, %v1400_v24  ;;  %v2185_v37 = vpack.c.bf16 %v1308_v20, %v1305_v19 }
  0x74   : > { %v1394_v27 = vand.u32 4294901760, %v1393_v23  ;;  %v1402_v31 = vsub.f32 %v1400_v24, %v1401_v28 }
  0x76   : > { %v1395_v30 = vsub.f32 %v1393_v23, %v1394_v27  ;;  %v1403_v33 = vand.u32 4294901760, %v1402_v31  ;;  %v2209_v40 = vpack.c.bf16 %v1401_v28, %v1394_v27 }
  0x77   : > { %1986 = vmatmul.mubr.f32.vlgmr.msra.gmra.mrb[0].mxu0 %v390_v8 }
  0x78   : > { %2144 = vmatpush3.bf16.msra.mxu0 %v2128_v11  ;;  %1992 = vmatprep.mubr.msk.f32.mxu0 %vm2406_vm0, %v2407_v1  ;;  %v1299_v11 = vand.u32 4294901760, %v1284_v9  ;;  %v1396_v32 = vand.u32 4294901760, %v1395_v30 }
  0x79   : > { %2187 = vmatprep.subr.bf16.mxu0 %v2405_v0 }
  0x7a   : > { %v1379_v13 = vsub.f32 %v1284_v9, %v1299_v11  ;;  %v2191_v34 = vpack.c.bf16 %v1403_v33, %v1396_v32  ;;  %v2182_v35 = vpack.c.bf16 %v1302_v12, %v1299_v11 }
  0x7c   : > { %v1380_v17 = vand.u32 4294901760, %v1379_v13  ;;  %v2194_v36 = vpack.c.bf16 %v1386_v14, %v1379_v13 }
  0x7e   : > { %v1381_v21 = vsub.f32 %v1379_v13, %v1380_v17  ;;  %v2206_v39 = vpack.c.bf16 %v1387_v18, %v1380_v17 }
  0x7f   : > { %1993 = vmatmul.mubr.f32.vlgmr.msra.gmra.mrb[0].mxu0 %v390_v8 }
  0x80   : > { %2080 = vmatprep.mubr.msk.f32.mxu0 %vm2406_vm0, %v2407_v1  ;;  %v1382_v25 = vand.u32 4294901760, %v1381_v21 }
 0x12f   : > { %v396_v57 = vpop.f32.mrb[0].mxu1 }
 0x130   : > { %v1959_v58 = vpop.f32.mrb[1].mxu1  ;;  %v397_v60 = vadd.f32 %v1870_v59, %v396_v57 }
 0x152   : > { %v778_v61 = vpop.f32.mrb[0].mxu0 }
 0x153   : > { %v2218_v62 = vadd.f32 %v778_v61, %v397_v60  ;;  %v1994_v63 = vpop.f32.mrb[1].mxu0 }
 0x155   : > { %v782_v2 = vmax.f32 %v2218_v62, 0.0 }
 0x157   : > { %v796_v3 = vsel %vm794_vm2, %v782_v2, 0 }
 0x158   : > { %v867_v4 = vand.u32 4294901760, %v796_v3 }
 0x15a   : > { %v868_v5 = vsub.f32 %v796_v3, %v867_v4 }
 0x15c   : > { %v869_v6 = vand.u32 4294901760, %v868_v5 }
 0x15e   : > { %v870_v7 = vsub.f32 %v868_v5, %v869_v6 }
 0x160   : > { %v871_v8 = vand.u32 4294901760, %v870_v7 }
 0x162   : > { %2004 = vmatmul.mubr.f32.vlgmr.msra.gmra.mrb[2].mxu1 %v871_v8 }
 0x163   : > { %2153 = vmatpush3.bf16.msra.mxu1 %v2152_v49  ;;  %2014 = vmatprep.mubr.msk.f32.mxu1 %vm2406_vm0, %v2407_v1 }
 0x164   : > { %2154 = vmatprep.subr.bf16.mxu1 %v2405_v0 }
 0x167   : > { %2156 = vmatpush3.bf16.msra.mxu1 %v2155_v52 }
 0x168   : > { %2157 = vmatprep.subr.bf16.mxu1 %v2405_v0 }
 0x16a   : > { %2015 = vmatmul.mubr.f32.vlgmr.msra.gmra.mrb[2].mxu1 %v867_v4 }
 0x16b   : > { %2159 = vmatpush3.bf16.msra.mxu1 %v2158_v53  ;;  %2025 = vmatprep.mubr.msk.f32.mxu1 %vm2406_vm0, %v2407_v1 }
 0x16c   : > { %2160 = vmatprep.subr.bf16.mxu1 %v2405_v0 }
 0x16f   : > { %2162 = vmatpush3.bf16.msra.mxu1 %v2161_v54  ;;  %v1872_v54 = vld [vmem:[%s2704_s6] ss:$0 sm:$0xff] }
 0x170   : > { %2163 = vmatprep.subr.bf16.mxu1 %v2405_v0 }
 0x172   : > { %2026 = vmatmul.mubr.f32.vlgmr.msra.gmra.mrb[2].mxu1 %v868_v5 }
 0x173   : > { %2165 = vmatpush3.bf16.msra.mxu1 %v2599_v29  ;;  %2036 = vmatprep.mubr.msk.f32.mxu1 %vm2406_vm0, %v2407_v1 }
 0x174   : > { %2166 = vmatprep.subr.bf16.mxu1 %v2405_v0 }
 0x177   : > { %2168 = vmatpush3.bf16.msra.mxu1 %v2609_v38 }
 0x178   : > { %2169 = vmatprep.subr.bf16.mxu1 %v2405_v0 }
 0x17a   : > { %2037 = vmatmul.mubr.f32.vlgmr.msra.gmra.mrb[2].mxu1 %v869_v6 }
 0x17b   : > { %2171 = vmatpush3.bf16.msra.mxu1 %v2170_v55  ;;  %2047 = vmatprep.mubr.msk.f32.mxu1 %vm2406_vm0, %v2407_v1 }
 0x17c   : > { %2172 = vmatprep.subr.bf16.mxu1 %v2405_v0 }
 0x17f   : > { %2174 = vmatpush3.bf16.msra.mxu1 %v2173_v56 }
 0x180   : > { %2175 = vmatprep.subr.bf16.mxu1 %v2405_v0 }
 0x182   : > { %2048 = vmatmul.mubr.f32.vlgmr.msra.gmra.mrb[2].mxu1 %v867_v4 }
 0x183   : > { %2177 = vmatpush3.bf16.msra.mxu1 %v2599_v29  ;;  %2058 = vmatprep.mubr.msk.f32.mxu1 %vm2406_vm0, %v2407_v1  ;;  %v2188_v29 = vpack.c.bf16 %v1389_v26, %v1382_v25 }
 0x184   : > { %2178 = vmatprep.subr.bf16.mxu1 %v2405_v0 }
 0x185   : > { %2189 = vmatpush3.bf16.msra.mxu0 %v2188_v29 }
 0x186   : > { %2190 = vmatprep.subr.bf16.mxu0 %v2405_v0 }
 0x187   : > { %2180 = vmatpush3.bf16.msra.mxu1 %v2609_v38  ;;  %v2197_v38 = vpack.c.bf16 %v1400_v24, %v1393_v23 }
 0x188   : > { %2181 = vmatprep.subr.bf16.mxu1 %v2405_v0 }
 0x189   : > { %2192 = vmatpush3.bf16.msra.mxu0 %v2191_v34 }
 0x18a   : > { %2059 = vmatmul.mubr.f32.vlgmr.msra.gmra.mrb[2].mxu1 %v867_v4  ;;  %2193 = vmatprep.subr.bf16.mxu0 %v2405_v0 }
 0x18b   : > { %2069 = vmatprep.mubr.msk.f32.mxu1 %vm2406_vm0, %v2407_v1  ;;  %2183 = vmatpush3.bf16.msra.mxu1 %v2182_v35 }
 0x18c   : > { %2184 = vmatprep.subr.bf16.mxu1 %v2405_v0 }
 0x18f   : > { %2186 = vmatpush3.bf16.msra.mxu1 %v2185_v37 }
 0x25d   : > { %v1279_v42 = vpop.f32.mrb[2].mxu1 }
 0x25e   : > { %v2219_v43 = vadd.f32 %v1871_v41, %v1279_v42  ;;  %v2060_v44 = vpop.f32.mrb[3].mxu1 }
 0x260   : > { %v1283_v45 = vmax.f32 %v2219_v43, 0.0 }
 0x262   : > { %v1296_v46 = vsel %vm794_vm2, %v1283_v45, 0 }
 0x263   : > { %v1367_v47 = vand.u32 4294901760, %v1296_v46 }
 0x265   : > { %v1368_v48 = vsub.f32 %v1296_v46, %v1367_v47  ;;  %2081 = vmatmul.mubr.f32.vlgmr.msra.gmra.mrb[2].mxu0 %v1367_v47 }
 0x266   : > { %2195 = vmatpush3.bf16.msra.mxu0 %v2194_v36  ;;  %2091 = vmatprep.mubr.msk.f32.mxu0 %vm2406_vm0, %v2407_v1 }
 0x267   : > { %v1369_v49 = vand.u32 4294901760, %v1368_v48  ;;  %2196 = vmatprep.subr.bf16.mxu0 %v2405_v0 }
 0x269   : > { %v1370_v50 = vsub.f32 %v1368_v48, %v1369_v49 }
 0x26a   : > { %2198 = vmatpush3.bf16.msra.mxu0 %v2197_v38 }
 0x26b   : > { %v1371_v51 = vand.u32 4294901760, %v1370_v50  ;;  %2199 = vmatprep.subr.bf16.mxu0 %v2405_v0 }
 0x26d   : > { %2070 = vmatmul.mubr.f32.vlgmr.msra.gmra.mrb[4].mxu1 %v1371_v51  ;;  %2092 = vmatmul.mubr.f32.vlgmr.msra.gmra.mrb[2].mxu0 %v1368_v48 }
 0x26e   : > { %2201 = vmatpush3.bf16.msra.mxu0 %v2182_v35  ;;  %2102 = vmatprep.mubr.msk.f32.mxu0 %vm2406_vm0, %v2407_v1 }
 0x26f   : > { %2202 = vmatprep.subr.bf16.mxu0 %v2405_v0 }
 0x272   : > { %2204 = vmatpush3.bf16.msra.mxu0 %v2185_v37 }
 0x273   : > { %2205 = vmatprep.subr.bf16.mxu0 %v2405_v0 }
 0x275   : > { %2103 = vmatmul.mubr.f32.vlgmr.msra.gmra.mrb[2].mxu0 %v1369_v49 }
 0x276   : > { %2207 = vmatpush3.bf16.msra.mxu0 %v2206_v39  ;;  %2113 = vmatprep.mubr.msk.f32.mxu0 %vm2406_vm0, %v2407_v1 }
 0x277   : > { %2208 = vmatprep.subr.bf16.mxu0 %v2405_v0 }
 0x27a   : > { %2210 = vmatpush3.bf16.msra.mxu0 %v2209_v40 }
 0x27b   : > { %2211 = vmatprep.subr.bf16.mxu0 %v2405_v0 }
 0x27d   : > { %2114 = vmatmul.mubr.f32.vlgmr.msra.gmra.mrb[2].mxu0 %v1367_v47 }
 0x27e   : > { %2213 = vmatpush3.bf16.msra.mxu0 %v2182_v35  ;;  %2124 = vmatprep.mubr.msk.f32.mxu0 %vm2406_vm0, %v2407_v1 }
 0x27f   : > { %2214 = vmatprep.subr.bf16.mxu0 %v2405_v0 }
 0x282   : > { %2216 = vmatpush3.bf16.msra.mxu0 %v2185_v37 }
 0x285   : > { %2125 = vmatmul.mubr.f32.vlgmr.msra.gmra.mrb[2].mxu0 %v1367_v47 }
 0x340   : > { %v1373_v52 = vpop.f32.mrb[4].mxu1 }
 0x341   : > { %v2071_v53 = vpop.f32.mrb[5].mxu1  ;;  %v1374_v55 = vadd.f32 %v1872_v54, %v1373_v52 }
 0x358   : > { %v1779_v56 = vpop.f32.mrb[2].mxu0 }
 0x359   : > { %v2221_v1 = vadd.f32 %v1779_v56, %v1374_v55  ;;  %v2126_v0 = vpop.f32.mrb[3].mxu0 }
 0x35b   : > { %1784 = vst.msk [vmem:[%s308_s23] sm:$0xff] %vm1783_vm3, %v2221_v1 }
 0x35c PF: > { %p18_p8 = scmp.ge.s32.totalorder %s2492_s11, 4   ;;  %s2717_s24 = smov %s2391_s25 }
 0x35d   : > { %s2718_s25 = smov %s2395_s26  ;;  %s2719_s26 = smov %s2518_s14 }
 0x35e   : > { %s2720_s27 = smov %s2492_s11  ;;  %20 = sbr.rel (!%p18_p8) target bundleno = 4 (0x4), region = 92 }
 0x365   :  { %1804 = vsyncpa [#allocation3], 1 }
 0x366   :  { %1806 = vsyncpa [#allocation3 + $0x1], 1 }
 0x367   :  { %1807 = vsyncpa [#allocation5], 1 }

// kernel: tpu_custom_call.1
= control target key start
LH: loop header
LB: loop body
LE: loop exit
PB: predicated region body
PF: predicated region fallthrough
CT: control target
= control target key end

     0   :  { %12 = vsyncpa [#allocation3], 0  ;;  %s2698_s0 = inlined_call_operand.hbm [shape: f32[16,16], index: 0, kind: input, shape index: {}]   ;;  %s2699_s1 = inlined_call_operand.hbm [shape: f32[16,32], index: 1, kind: input, shape index: {}]   ;;  %s2700_s2 = inlined_call_operand.vmem [shape: f32[1,32], index: 2, kind: input, shape index: {}]   ;;  %s2701_s3 = inlined_call_operand.vmem [shape: f32[32,32], index: 3, kind: input, shape index: {}]   ;;  %s2702_s4 = inlined_call_operand.vmem [shape: f32[1,32], index: 4, kind: input, shape index: {}]   ;;  %s2703_s5 = inlined_call_operand.vmem [shape: f32[32,4], index: 5, kind: input, shape index: {}]   ;;  %s2704_s6 = inlined_call_operand.vmem [shape: f32[1,4], index: 6, kind: input, shape index: {}]   ;;  %s2705_s7 = inlined_call_operand.vmem [shape: f32[16,4], index: 7, kind: output, shape index: {}]  }
   0x1   :  { %14 = vsyncpa [#allocation3 + $0x1], 0 }
   0x2   :  { %15 = vsyncpa [#allocation5], 0  ;;  %s2448_s24 = smov 0   ;;  %s2450_s25 = smov 0  }
   0x3   :  { %s2452_s26 = smov 0   ;;  %s2454_s27 = smov 0  }
   0x4 LB: > { %s2467_s28 = sadd.s32 4294967295, %s2399_s27   ;;  %p41_p0 = scmp.ne.s32.totalorder %s2391_s25, %s2387_s24  ;;  %s2399_s27 = sphi %s2454_s27, %s2720_s27   ;;  %s2395_s26 = sphi %s2452_s26, %s2719_s26   ;;  %s2391_s25 = sphi %s2450_s25, %s2718_s25   ;;  %s2387_s24 = sphi %s2448_s24, %s2717_s24  }
   0x5   : > { %p2706_p1 = scmp.eq.s32.totalorder %s2467_s28, 0  ;;  %p1861_p2 = scmp.ge.s32.totalorder %s2399_s27, 1 }
   0x6   : > { %p204_p3 = scmp.lt.s32.totalorder %s2399_s27, 3  ;;  %s2401_s8 = smov [#allocation4]  }
   0x7   : > { %p2475_p4 = por %p2706_p1, %p41_p0  ;;  %s216_s9 = sshll.u32 %s2401_s8, 4  ;;  %s217_s9 = int_to_ptr.vmem [resolvable:$true] %s216_s9 }
   0x8   : > { %p2479_p5 = pnand %p1861_p2, %p204_p3  ;;  %s2492_s11 = sadd.s32 1, %s2399_s27  }
   0x9   : > { %s2709_s29 = scalar_select %p2475_p4, 1, 0 }
   0xa   : > { %s2710_s30 = scalar_select %p2479_p5, 1, 0 }
   0xb   : > { %p2254_p6 = pneg %p2479_p5  ;;  %s28_s12 = sadd.s32 1, %s2395_s26 }
   0xc   : > { %s25_s13 = ssub.s32 %s2399_s27, %s2492_s11  ;;  %s2303_s16 = scalar_lea.hbm %s2699_s1, 256 }
   0xd   : > { %p2487_p7 = pnand %p2254_p6, %p2706_p1  ;;  %p2304_p8 = scmp.ne.s32.totalorder %s2699_s1, %s2303_s16 }
   0xe   : > { %p2310_p12 = scmp.lt.u32.totalorder %s2303_s16, %s2699_s1 }
   0xf   : > { %p2305_p9 = pneg %p2487_p7 }
  0x11   : > { %p2306_p10 = pnand %p2305_p9, %p2304_p8 }
  0x13   : > { %p2307_p11 = pneg %p2306_p10 }
  0x15   : > { %p2312_p13 = pnand %p2310_p12, %p2307_p11 }
  0x17   : > { %2315 = shalt.err (!%p2312_p13)
}
  0x18   : > { %s2316_s21 = scalar_lea.vmem %s217_s9, 256  ;;  %p2324_p6 = scmp.lt.s32.totalorder %s217_s9, %s217_s9 }
  0x19   : > { %p2317_p0 = scmp.ne.s32.totalorder %s217_s9, %s2316_s21  ;;  %p2325_p1 = scmp.lt.s32.totalorder %s2316_s21, %s2316_s21 }
  0x1b   : > { %p2319_p2 = pnand %p2317_p0, %p2305_p9  ;;  %p2326_p4 = por %p2325_p1, %p2324_p6 }
  0x1d   : > { %p2320_p3 = pneg %p2319_p2 }
  0x1f   : > { %p2327_p5 = pnand %p2326_p4, %p2320_p3 }
  0x21   : > { %2330 = shalt.err (!%p2327_p5)
}
  0x22   : > { %s2402_s22 = smov 128   ;;  %s2403_s23 = smov 8  }
  0x23   : > { %2257 = dma.hbm_to_vmem [thread:$0]  (!%p2487_p7), %s2699_s1, 256, %s217_s9, [#allocation5], %s2402_s22, %s2402_s22, %s2403_s23  }
  0x24   : > { %p26_p8 = scmp.eq.s32.totalorder %s25_s13, 0  ;;  %p35_p9 = scmp.ne.s32.totalorder %s2395_s26, %s2391_s25 }
  0x25   : > { %p36_p1 = scmp.eq.s32.totalorder %s2399_s27, 0  ;;  %p2263_p4 = scmp.lt.s32.totalorder %s2399_s27, 2 }
  0x26   : > { %s2518_s14 = scalar_select %p26_p8, %s2395_s26, %s28_s12  }
  0x27   : > { %p37_p5 = por %p36_p1, %p35_p9  ;;  %s245_s15 = sand.u32 1, %s2395_s26  }
  0x28   : > { %s1864_s16 = sshll.u32 %s245_s15, 3  ;;  %s1865_s17 = sshll.u32 %s2399_s27, 7 }
  0x29   : > { %s2525_s20 = scalar_lea.hbm %s2698_s0, %s1865_s17  ;;  %s249_s9 = scalar_lea.vmem [#allocation2], %s1864_s16 }
  0x2a   : > { %s256_s10 = sshll.u32 %s249_s9, 4  ;;  %p2529_p7 = pnand %p2263_p4, %p37_p5  ;;  %s2527_s10 = int_to_ptr.vmem [resolvable:$true] %s256_s10 }
  0x2b   : > { %s246_s27 = scalar_lea.sflag [#allocation3], %s245_s15  ;;  %s2331_s13 = scalar_lea.hbm %s2525_s20, 128 }
  0x2c   : > { %p2332_p10 = scmp.ne.s32.totalorder %s2525_s20, %s2331_s13  ;;  %p2333_p11 = pneg %p2529_p7 }
  0x2d   : > { %s2336_s23 = scalar_lea.hbm %s2698_s0, 256  ;;  %p2337_p0 = scmp.lt.u32.totalorder %s2525_s20, %s2698_s0 }
  0x2e   : > { %p2334_p12 = pnand %p2333_p11, %p2332_p10  ;;  %p2338_p2 = scmp.lt.u32.totalorder %s2336_s23, %s2331_s13 }
  0x2f   : > { %p2340_p6 = scmp.lt.u32.totalorder %s2331_s13, %s2525_s20 }
  0x30   : > { %p2335_p13 = pneg %p2334_p12  ;;  %p2339_p3 = por %p2338_p2, %p2337_p0 }
  0x32   : > { %p2341_p8 = por %p2340_p6, %p2339_p3 }
  0x34   : > { %p2342_p9 = pnand %p2341_p8, %p2335_p13 }
  0x36   : > { %2345 = shalt.err (!%p2342_p9)
}
  0x37   : > { %s2346_s15 = scalar_lea.vmem %s2527_s10, 128  ;;  %s2404_s16 = smov [#allocation2]  }
  0x38   : > { %p2347_p1 = scmp.ne.s32.totalorder %s2527_s10, %s2346_s15  ;;  %s2351_s17 = sshll.u32 %s2404_s16, 4  ;;  %s2352_s17 = int_to_ptr.vmem [resolvable:$false] %s2351_s17 }
  0x39   : > { %s2353_s18 = scalar_lea.vmem %s2352_s17, 256  ;;  %p2354_p10 = scmp.lt.s32.totalorder %s2527_s10, %s2352_s17 }
  0x3a   : > { %p2349_p4 = pnand %p2347_p1, %p2333_p11  ;;  %p2355_p12 = scmp.lt.s32.totalorder %s2353_s18, %s2346_s15 }
  0x3c   : > { %p2350_p5 = pneg %p2349_p4  ;;  %p2356_p0 = por %p2355_p12, %p2354_p10 }
  0x3e   : > { %p2357_p2 = pnand %p2356_p0, %p2350_p5 }
  0x40   : > { %2360 = shalt.err (!%p2357_p2)
}
  0x41   : > { %2261 = dma.hbm_to_vmem [thread:$0]  (!%p2529_p7), %s2525_s20, 128, %s2527_s10, %s246_s27  }
  0x42   : > { %p2713_p13 = scmp.ne.s32.totalorder %s2710_s30, 0 }
  0x43   : > { %s267_s19 = sand.u32 (!%p2713_p13), 1, %s2391_s25   ;;  %p2714_p11 = scmp.ne.s32.totalorder (!%p2713_p13), %s2709_s29, 0 }
  0x44   : > { %265 = sbr.rel (%p2713_p13) target bundleno = 860 (0x35c), region = 48  ;;  %s1867_s9 = sshll.u32 (!%p2713_p13), %s267_s19, 3 }
  0x45   : > { %s268_s13 = scalar_lea.sflag (!%p2713_p13), [#allocation3], %s267_s19  ;;  %s271_s21 = scalar_lea.vmem (!%p2713_p13), [#allocation2], %s1867_s9 }
  0x4b   : > { %2378 = dma.done.wait (%p2714_p11), %s268_s13, 128  }
  0x4c   : > { %2380 = vsyncadd (%p2714_p11), %s268_s13, 4294967168  ;;  %p2715_p3 = scmp.eq.s32.totalorder %s2467_s28, 0 }
  0x4e   : > { %2382 = dma.done.wait (%p2715_p3), [#allocation5], 256   ;;  %p2716_p6 = pmov %p2715_p3 }
  0x4f   : > { %v2405_v0 = vmov 0.0|0.0   ;;  %vm2406_vm0 = vmmov 0   ;;  %v2407_v1 = vmov 0.0   ;;  %vm319_vm1 = vcmask 130048   ;;  %v310_v2 = vld [vmem:[#allocation4] sm:$0xff]  ;;  %v311_v3 = vld [vmem:[#allocation4 + $0x8] sm:$0xff] }
  0x50   : > { %2384 = vsyncadd (%p2716_p6), [#allocation5], 4294967040  ;;  %2130 = vmatprep.subr.bf16.mxu0 %v2405_v0  ;;  %1964 = vmatprep.mubr.msk.f32.mxu0 %vm2406_vm0, %v2407_v1  ;;  %v309_v4 = vld [vmem:[%s271_s21] sm:$0xff]  ;;  %v324_v5 = vand.u32 4294901760, %v310_v2  ;;  %v327_v6 = vand.u32 4294901760, %v311_v3  ;;  %v785_v32 = vld [vmem:[%s2701_s3 + $0x10] sm:$0xff] }
  0x51   : > { %2127 = vmatprep.subr.bf16.mxu1 %v2405_v0  ;;  %1957 = vmatprep.mubr.msk.f32.mxu1 %vm2406_vm0, %v2407_v1  ;;  %v321_v7 = vsel %vm319_vm1, %v309_v4, 0  ;;  %v783_v25 = vld [vmem:[%s2701_s3] sm:$0xff]  ;;  %v784_v26 = vld [vmem:[%s2701_s3 + $0x8] sm:$0xff]  ;;  %v786_v33 = vld [vmem:[%s2701_s3 + $0x18] sm:$0xff]  ;;  %v805_v34 = vand.u32 4294901760, %v785_v32  ;;  %vm794_vm2 = vcmask 261120  }
  0x52   : > { %v390_v8 = vand.u32 4294901760, %v321_v7  ;;  %v402_v9 = vsub.f32 %v310_v2, %v324_v5  ;;  %v409_v10 = vsub.f32 %v311_v3, %v327_v6  ;;  %v2128_v11 = vpack.c.bf16 %v327_v6, %v324_v5  ;;  %v1870_v59 = vld [vmem:[%s2700_s2] ss:$0 sm:$0xff]  ;;  %p305_p7 = scmp.lt.s32.totalorder %s2467_s28, 1 }
  0x53   : > { %v799_v27 = vand.u32 4294901760, %v783_v25  ;;  %v802_v28 = vand.u32 4294901760, %v784_v26  ;;  %v808_v35 = vand.u32 4294901760, %v786_v33  ;;  %v893_v39 = vsub.f32 %v785_v32, %v805_v34 }
  0x54   : > { %v391_v12 = vsub.f32 %v321_v7, %v390_v8  ;;  %v403_v13 = vand.u32 4294901760, %v402_v9  ;;  %v410_v14 = vand.u32 4294901760, %v409_v10  ;;  %2129 = vmatpush3.bf16.msra.mxu1 %v2128_v11  ;;  %v2134_v23 = vpack.c.bf16 %v409_v10, %v402_v9  ;;  %s2722_s28 = smov (!%p305_p7, %s2467_s28), 1 }
  0x55   : > { %2145 = vmatprep.subr.bf16.mxu1 %v2405_v0  ;;  %v2599_v29 = vpack.c.bf16 %v802_v28, %v799_v27  ;;  %v879_v30 = vsub.f32 %v783_v25, %v799_v27  ;;  %v886_v31 = vsub.f32 %v784_v26, %v802_v28  ;;  %v2609_v38 = vpack.c.bf16 %v808_v35, %v805_v34  ;;  %s1869_s12 = sshll.u32 %s2722_s28, 3 }
  0x56   : > { %v392_v15 = vand.u32 4294901760, %v391_v12  ;;  %v404_v16 = vsub.f32 %v402_v9, %v403_v13  ;;  %v411_v17 = vsub.f32 %v409_v10, %v410_v14  ;;  %v2140_v24 = vpack.c.bf16 %v410_v14, %v403_v13  ;;  %v1284_v9 = vld [vmem:[%s2703_s5] sm:$0xff]  ;;  %v1285_v10 = vld [vmem:[%s2703_s5 + $0x8] sm:$0xff]  ;;  %s308_s23 = scalar_lea.vmem %s2705_s7, %s1869_s12 }
  0x57   : > { %v880_v36 = vand.u32 4294901760, %v879_v30  ;;  %v887_v37 = vand.u32 4294901760, %v886_v31  ;;  %v900_v40 = vsub.f32 %v786_v33, %v808_v35  ;;  %v894_v44 = vand.u32 4294901760, %v893_v39 }
  0x58   : > { %v393_v18 = vsub.f32 %v391_v12, %v392_v15  ;;  %v405_v19 = vand.u32 4294901760, %v404_v16  ;;  %v412_v20 = vand.u32 4294901760, %v411_v17  ;;  %v2158_v53 = vpack.c.bf16 %v886_v31, %v879_v30  ;;  %v1287_v16 = vld [vmem:[%s2703_s5 + $0x18] sm:$0xff] }
  0x59   : > { %v881_v41 = vsub.f32 %v879_v30, %v880_v36  ;;  %v888_v42 = vsub.f32 %v886_v31, %v887_v37  ;;  %v901_v45 = vand.u32 4294901760, %v900_v40  ;;  %v895_v47 = vsub.f32 %v893_v39, %v894_v44 }
  0x5a   : > { %v394_v21 = vand.u32 4294901760, %v393_v18  ;;  %v2131_v22 = vpack.c.bf16 %v412_v20, %v405_v19  ;;  %v2161_v54 = vpack.c.bf16 %v900_v40, %v893_v39  ;;  %v2170_v55 = vpack.c.bf16 %v887_v37, %v880_v36 }
  0x5b   : > { %v882_v43 = vand.u32 4294901760, %v881_v41  ;;  %v889_v46 = vand.u32 4294901760, %v888_v42  ;;  %v902_v48 = vsub.f32 %v900_v40, %v901_v45  ;;  %v896_v50 = vand.u32 4294901760, %v895_v47  ;;  %v1871_v41 = vld [vmem:[%s2702_s4] ss:$0 sm:$0xff] }
  0x5c   : > { %1958 = vmatmul.mubr.f32.vlgmr.msra.gmra.mrb[0].mxu1 %v394_v21  ;;  %2132 = vmatpush3.bf16.msra.mxu0 %v2131_v22  ;;  %v2173_v56 = vpack.c.bf16 %v901_v45, %v894_v44  ;;  %v1308_v20 = vand.u32 4294901760, %v1287_v16  ;;  %vm1783_vm3 = vcmask 31744  }
  0x5d   : > { %2003 = vmatprep.mubr.msk.f32.mxu1 %vm2406_vm0, %v2407_v1  ;;  %2133 = vmatprep.subr.bf16.mxu0 %v2405_v0  ;;  %v2152_v49 = vpack.c.bf16 %v889_v46, %v882_v43  ;;  %v903_v51 = vand.u32 4294901760, %v902_v48 }
  0x5e   : > { %2147 = vmatpush3.bf16.msra.mxu1 %v2599_v29 }
  0x5f   : > { %1965 = vmatmul.mubr.f32.vlgmr.msra.gmra.mrb[0].mxu0 %v390_v8  ;;  %2148 = vmatprep.subr.bf16.mxu1 %v2405_v0  ;;  %v2155_v52 = vpack.c.bf16 %v903_v51, %v896_v50 }
  0x60   : > { %2135 = vmatpush3.bf16.msra.mxu0 %v2134_v23  ;;  %1971 = vmatprep.mubr.msk.f32.mxu0 %vm2406_vm0, %v2407_v1 }
  0x61   : > { %2136 = vmatprep.subr.bf16.mxu0 %v2405_v0 }
  0x62   : > { %2150 = vmatpush3.bf16.msra.mxu1 %v2609_v38 }
  0x63   : > { %2151 = vmatprep.subr.bf16.mxu1 %v2405_v0 }
  0x67   : > { %1972 = vmatmul.mubr.f32.vlgmr.msra.gmra.mrb[0].mxu0 %v391_v12  ;;  %v1302_v12 = vand.u32 4294901760, %v1285_v10 }
  0x68   : > { %2138 = vmatpush3.bf16.msra.mxu0 %v2128_v11  ;;  %1978 = vmatprep.mubr.msk.f32.mxu0 %vm2406_vm0, %v2407_v1 }
  0x69   : > { %2139 = vmatprep.subr.bf16.mxu0 %v2405_v0  ;;  %v1386_v14 = vsub.f32 %v1285_v10, %v1302_v12 }
  0x6b   : > { %v1387_v18 = vand.u32 4294901760, %v1386_v14 }
  0x6d   : > { %v1388_v22 = vsub.f32 %v1386_v14, %v1387_v18 }
  0x6f   : > { %1979 = vmatmul.mubr.f32.vlgmr.msra.gmra.mrb[0].mxu0 %v392_v15  ;;  %v1286_v15 = vld [vmem:[%s2703_s5 + $0x10] sm:$0xff]  ;;  %v1389_v26 = vand.u32 4294901760, %v1388_v22 }
  0x70   : > { %2141 = vmatpush3.bf16.msra.mxu0 %v2140_v24  ;;  %1985 = vmatprep.mubr.msk.f32.mxu0 %vm2406_vm0, %v2407_v1  ;;  %v1305_v19 = vand.u32 4294901760, %v1286_v15  ;;  %v1400_v24 = vsub.f32 %v1287_v16, %v1308_v20 }
  0x71   : > { %2142 = vmatprep.subr.bf16.mxu0 %v2405_v0 }
  0x72   : > { %v1393_v23 = vsub.f32 %v1286_v15, %v1305_v19  ;;  %v1401_v28 = vand.u32 4294901760, %v1400_v24  ;;  %v2185_v37 = vpack.c.bf16 %v1308_v20, %v1305_v19 }
  0x74   : > { %v1394_v27 = vand.u32 4294901760, %v1393_v23  ;;  %v1402_v31 = vsub.f32 %v1400_v24, %v1401_v28 }
  0x76   : > { %v1395_v30 = vsub.f32 %v1393_v23, %v1394_v27  ;;  %v1403_v33 = vand.u32 4294901760, %v1402_v31  ;;  %v2209_v40 = vpack.c.bf16 %v1401_v28, %v1394_v27 }
  0x77   : > { %1986 = vmatmul.mubr.f32.vlgmr.msra.gmra.mrb[0].mxu0 %v390_v8 }
  0x78   : > { %2144 = vmatpush3.bf16.msra.mxu0 %v2128_v11  ;;  %1992 = vmatprep.mubr.msk.f32.mxu0 %vm2406_vm0, %v2407_v1  ;;  %v1299_v11 = vand.u32 4294901760, %v1284_v9  ;;  %v1396_v32 = vand.u32 4294901760, %v1395_v30 }
  0x79   : > { %2187 = vmatprep.subr.bf16.mxu0 %v2405_v0 }
  0x7a   : > { %v1379_v13 = vsub.f32 %v1284_v9, %v1299_v11  ;;  %v2191_v34 = vpack.c.bf16 %v1403_v33, %v1396_v32  ;;  %v2182_v35 = vpack.c.bf16 %v1302_v12, %v1299_v11 }
  0x7c   : > { %v1380_v17 = vand.u32 4294901760, %v1379_v13  ;;  %v2194_v36 = vpack.c.bf16 %v1386_v14, %v1379_v13 }
  0x7e   : > { %v1381_v21 = vsub.f32 %v1379_v13, %v1380_v17  ;;  %v2206_v39 = vpack.c.bf16 %v1387_v18, %v1380_v17 }
  0x7f   : > { %1993 = vmatmul.mubr.f32.vlgmr.msra.gmra.mrb[0].mxu0 %v390_v8 }
  0x80   : > { %2080 = vmatprep.mubr.msk.f32.mxu0 %vm2406_vm0, %v2407_v1  ;;  %v1382_v25 = vand.u32 4294901760, %v1381_v21 }
 0x12f   : > { %v396_v57 = vpop.f32.mrb[0].mxu1 }
 0x130   : > { %v1959_v58 = vpop.f32.mrb[1].mxu1  ;;  %v397_v60 = vadd.f32 %v1870_v59, %v396_v57 }
 0x152   : > { %v778_v61 = vpop.f32.mrb[0].mxu0 }
 0x153   : > { %v2218_v62 = vadd.f32 %v778_v61, %v397_v60  ;;  %v1994_v63 = vpop.f32.mrb[1].mxu0 }
 0x155   : > { %v782_v2 = vmax.f32 %v2218_v62, 0.0 }
 0x157   : > { %v796_v3 = vsel %vm794_vm2, %v782_v2, 0 }
 0x158   : > { %v867_v4 = vand.u32 4294901760, %v796_v3 }
 0x15a   : > { %v868_v5 = vsub.f32 %v796_v3, %v867_v4 }
 0x15c   : > { %v869_v6 = vand.u32 4294901760, %v868_v5 }
 0x15e   : > { %v870_v7 = vsub.f32 %v868_v5, %v869_v6 }
 0x160   : > { %v871_v8 = vand.u32 4294901760, %v870_v7 }
 0x162   : > { %2004 = vmatmul.mubr.f32.vlgmr.msra.gmra.mrb[2].mxu1 %v871_v8 }
 0x163   : > { %2153 = vmatpush3.bf16.msra.mxu1 %v2152_v49  ;;  %2014 = vmatprep.mubr.msk.f32.mxu1 %vm2406_vm0, %v2407_v1 }
 0x164   : > { %2154 = vmatprep.subr.bf16.mxu1 %v2405_v0 }
 0x167   : > { %2156 = vmatpush3.bf16.msra.mxu1 %v2155_v52 }
 0x168   : > { %2157 = vmatprep.subr.bf16.mxu1 %v2405_v0 }
 0x16a   : > { %2015 = vmatmul.mubr.f32.vlgmr.msra.gmra.mrb[2].mxu1 %v867_v4 }
 0x16b   : > { %2159 = vmatpush3.bf16.msra.mxu1 %v2158_v53  ;;  %2025 = vmatprep.mubr.msk.f32.mxu1 %vm2406_vm0, %v2407_v1 }
 0x16c   : > { %2160 = vmatprep.subr.bf16.mxu1 %v2405_v0 }
 0x16f   : > { %2162 = vmatpush3.bf16.msra.mxu1 %v2161_v54  ;;  %v1872_v54 = vld [vmem:[%s2704_s6] ss:$0 sm:$0xff] }
 0x170   : > { %2163 = vmatprep.subr.bf16.mxu1 %v2405_v0 }
 0x172   : > { %2026 = vmatmul.mubr.f32.vlgmr.msra.gmra.mrb[2].mxu1 %v868_v5 }
 0x173   : > { %2165 = vmatpush3.bf16.msra.mxu1 %v2599_v29  ;;  %2036 = vmatprep.mubr.msk.f32.mxu1 %vm2406_vm0, %v2407_v1 }
 0x174   : > { %2166 = vmatprep.subr.bf16.mxu1 %v2405_v0 }
 0x177   : > { %2168 = vmatpush3.bf16.msra.mxu1 %v2609_v38 }
 0x178   : > { %2169 = vmatprep.subr.bf16.mxu1 %v2405_v0 }
 0x17a   : > { %2037 = vmatmul.mubr.f32.vlgmr.msra.gmra.mrb[2].mxu1 %v869_v6 }
 0x17b   : > { %2171 = vmatpush3.bf16.msra.mxu1 %v2170_v55  ;;  %2047 = vmatprep.mubr.msk.f32.mxu1 %vm2406_vm0, %v2407_v1 }
 0x17c   : > { %2172 = vmatprep.subr.bf16.mxu1 %v2405_v0 }
 0x17f   : > { %2174 = vmatpush3.bf16.msra.mxu1 %v2173_v56 }
 0x180   : > { %2175 = vmatprep.subr.bf16.mxu1 %v2405_v0 }
 0x182   : > { %2048 = vmatmul.mubr.f32.vlgmr.msra.gmra.mrb[2].mxu1 %v867_v4 }
 0x183   : > { %2177 = vmatpush3.bf16.msra.mxu1 %v2599_v29  ;;  %2058 = vmatprep.mubr.msk.f32.mxu1 %vm2406_vm0, %v2407_v1  ;;  %v2188_v29 = vpack.c.bf16 %v1389_v26, %v1382_v25 }
 0x184   : > { %2178 = vmatprep.subr.bf16.mxu1 %v2405_v0 }
 0x185   : > { %2189 = vmatpush3.bf16.msra.mxu0 %v2188_v29 }
 0x186   : > { %2190 = vmatprep.subr.bf16.mxu0 %v2405_v0 }
 0x187   : > { %2180 = vmatpush3.bf16.msra.mxu1 %v2609_v38  ;;  %v2197_v38 = vpack.c.bf16 %v1400_v24, %v1393_v23 }
 0x188   : > { %2181 = vmatprep.subr.bf16.mxu1 %v2405_v0 }
 0x189   : > { %2192 = vmatpush3.bf16.msra.mxu0 %v2191_v34 }
 0x18a   : > { %2059 = vmatmul.mubr.f32.vlgmr.msra.gmra.mrb[2].mxu1 %v867_v4  ;;  %2193 = vmatprep.subr.bf16.mxu0 %v2405_v0 }
 0x18b   : > { %2069 = vmatprep.mubr.msk.f32.mxu1 %vm2406_vm0, %v2407_v1  ;;  %2183 = vmatpush3.bf16.msra.mxu1 %v2182_v35 }
 0x18c   : > { %2184 = vmatprep.subr.bf16.mxu1 %v2405_v0 }
 0x18f   : > { %2186 = vmatpush3.bf16.msra.mxu1 %v2185_v37 }
 0x25d   : > { %v1279_v42 = vpop.f32.mrb[2].mxu1 }
 0x25e   : > { %v2219_v43 = vadd.f32 %v1871_v41, %v1279_v42  ;;  %v2060_v44 = vpop.f32.mrb[3].mxu1 }
 0x260   : > { %v1283_v45 = vmax.f32 %v2219_v43, 0.0 }
 0x262   : > { %v1296_v46 = vsel %vm794_vm2, %v1283_v45, 0 }
 0x263   : > { %v1367_v47 = vand.u32 4294901760, %v1296_v46 }
 0x265   : > { %v1368_v48 = vsub.f32 %v1296_v46, %v1367_v47  ;;  %2081 = vmatmul.mubr.f32.vlgmr.msra.gmra.mrb[2].mxu0 %v1367_v47 }
 0x266   : > { %2195 = vmatpush3.bf16.msra.mxu0 %v2194_v36  ;;  %2091 = vmatprep.mubr.msk.f32.mxu0 %vm2406_vm0, %v2407_v1 }
 0x267   : > { %v1369_v49 = vand.u32 4294901760, %v1368_v48  ;;  %2196 = vmatprep.subr.bf16.mxu0 %v2405_v0 }
 0x269   : > { %v1370_v50 = vsub.f32 %v1368_v48, %v1369_v49 }
 0x26a   : > { %2198 = vmatpush3.bf16.msra.mxu0 %v2197_v38 }
 0x26b   : > { %v1371_v51 = vand.u32 4294901760, %v1370_v50  ;;  %2199 = vmatprep.subr.bf16.mxu0 %v2405_v0 }
 0x26d   : > { %2070 = vmatmul.mubr.f32.vlgmr.msra.gmra.mrb[4].mxu1 %v1371_v51  ;;  %2092 = vmatmul.mubr.f32.vlgmr.msra.gmra.mrb[2].mxu0 %v1368_v48 }
 0x26e   : > { %2201 = vmatpush3.bf16.msra.mxu0 %v2182_v35  ;;  %2102 = vmatprep.mubr.msk.f32.mxu0 %vm2406_vm0, %v2407_v1 }
 0x26f   : > { %2202 = vmatprep.subr.bf16.mxu0 %v2405_v0 }
 0x272   : > { %2204 = vmatpush3.bf16.msra.mxu0 %v2185_v37 }
 0x273   : > { %2205 = vmatprep.subr.bf16.mxu0 %v2405_v0 }
 0x275   : > { %2103 = vmatmul.mubr.f32.vlgmr.msra.gmra.mrb[2].mxu0 %v1369_v49 }
 0x276   : > { %2207 = vmatpush3.bf16.msra.mxu0 %v2206_v39  ;;  %2113 = vmatprep.mubr.msk.f32.mxu0 %vm2406_vm0, %v2407_v1 }
 0x277   : > { %2208 = vmatprep.subr.bf16.mxu0 %v2405_v0 }
 0x27a   : > { %2210 = vmatpush3.bf16.msra.mxu0 %v2209_v40 }
 0x27b   : > { %2211 = vmatprep.subr.bf16.mxu0 %v2405_v0 }
 0x27d   : > { %2114 = vmatmul.mubr.f32.vlgmr.msra.gmra.mrb[2].mxu0 %v1367_v47 }
 0x27e   : > { %2213 = vmatpush3.bf16.msra.mxu0 %v2182_v35  ;;  %2124 = vmatprep.mubr.msk.f32.mxu0 %vm2406_vm0, %v2407_v1 }
 0x27f   : > { %2214 = vmatprep.subr.bf16.mxu0 %v2405_v0 }
 0x282   : > { %2216 = vmatpush3.bf16.msra.mxu0 %v2185_v37 }
 0x285   : > { %2125 = vmatmul.mubr.f32.vlgmr.msra.gmra.mrb[2].mxu0 %v1367_v47 }
 0x340   : > { %v1373_v52 = vpop.f32.mrb[4].mxu1 }
 0x341   : > { %v2071_v53 = vpop.f32.mrb[5].mxu1  ;;  %v1374_v55 = vadd.f32 %v1872_v54, %v1373_v52 }
 0x358   : > { %v1779_v56 = vpop.f32.mrb[2].mxu0 }
 0x359   : > { %v2221_v1 = vadd.f32 %v1779_v56, %v1374_v55  ;;  %v2126_v0 = vpop.f32.mrb[3].mxu0 }
 0x35b   : > { %1784 = vst.msk [vmem:[%s308_s23] sm:$0xff] %vm1783_vm3, %v2221_v1 }
 0x35c PF: > { %p18_p8 = scmp.ge.s32.totalorder %s2492_s11, 4   ;;  %s2717_s24 = smov %s2391_s25 }
 0x35d   : > { %s2718_s25 = smov %s2395_s26  ;;  %s2719_s26 = smov %s2518_s14 }
 0x35e   : > { %s2720_s27 = smov %s2492_s11  ;;  %20 = sbr.rel (!%p18_p8) target bundleno = 4 (0x4), region = 92 }
 0x365   :  { %1804 = vsyncpa [#allocation3], 1 }
 0x366   :  { %1806 = vsyncpa [#allocation3 + $0x1], 1 }
 0x367   :  { %1807 = vsyncpa [#allocation5], 1 }

</bundles_post_ra>
